<compile_context>
chip_gen: v5e
topology: v5e:2x2
jax: 0.10.0
libtpu: 0.0.40
codegen_flags: <defaults>
</compile_context>

<pallas_src>
import functools

import jax
import jax.numpy as jnp
from jax.experimental import pallas as pl
from jax.experimental.pallas import tpu as pltpu


def _focal_kernel(x_ref, t_ref, o_ref, acc_ref, *, alpha, gamma, hw, tile):
    """One grid step: (1, C, TILE) logits block + (1, 1, TILE) target block.

    Accumulates per-lane focal losses of one batch into a (1, TILE) VMEM
    scratch; the final step of each batch reduces the scratch, applies alpha
    and writes the per-batch partial sum into that batch's output block.
    """
    s = pl.program_id(1)
    ns = pl.num_programs(1)

    @pl.when(s == 0)
    def _init():
        acc_ref[...] = jnp.zeros_like(acc_ref)

    x = x_ref[0].astype(jnp.float32)          # (C, TILE)
    tgt = t_ref[0]                            # (1, TILE) int32

    # log-softmax pieces: per-lane reductions over the channel (sublane) axis.
    m = jnp.max(x, axis=0, keepdims=True)                       # (1, TILE)
    denom = jnp.sum(jnp.exp(x - m), axis=0, keepdims=True)      # (1, TILE)

    # gather the target-channel logit via a one-hot sublane reduce.
    cls = jax.lax.broadcasted_iota(jnp.int32, x.shape, 0)       # (C, TILE)
    x_t = jnp.sum(jnp.where(cls == tgt, x, 0.0), axis=0, keepdims=True)

    logp_t = (x_t - m) - jnp.log(denom)        # log_softmax at the target class
    p_t = jnp.exp(logp_t)                      # softmax at the target class
    omp = 1.0 - p_t

    # (1 - p)^gamma with fast paths for the common small integer gammas.
    if gamma == 2.0:
        w = omp * omp
    elif gamma == 1.0:
        w = omp
    elif gamma == 0.0:
        w = jnp.ones_like(omp)
    else:
        w = jnp.power(omp, jnp.float32(gamma))

    loss_lane = w * (-logp_t)                  # (1, TILE); alpha applied at the end

    # mask lanes beyond H*W (ragged last tile); where-select kills any
    # NaN/garbage coming from the padded (out-of-bounds) part of the block.
    lane = s * tile + jax.lax.broadcasted_iota(jnp.int32, (1, tile), 1)
    loss_lane = jnp.where(lane < hw, loss_lane, 0.0)

    acc_ref[...] += loss_lane

    @pl.when(s == ns - 1)
    def _finalize():
        total_b = jnp.sum(acc_ref[...]) * jnp.float32(alpha)
        # broadcast into the full (1, 8, 128) block -> unmasked lane-dense store
        o_ref[...] = total_b * jnp.ones_like(o_ref)


def focal_loss_pallas(logits, target, alpha=4.0, gamma=2.0, reduction="mean"):
    """Pallas focal loss. logits: (B, C, *spatial) float; target: (B, *spatial) int."""
    if reduction not in ("mean", "sum"):
        # TODO(synk): reduction='none' (per-pixel loss map output) not implemented.
        raise NotImplementedError(f"Invalid/unsupported reduction mode: {reduction}")
    # TODO(synk): per-class `alphas` reweighting (default all-ones in the original,
    # never used by the FocalLoss module) is not implemented.

    B, C = int(logits.shape[0]), int(logits.shape[1])
    spatial = tuple(int(d) for d in logits.shape[2:])
    HW = 1
    for d in spatial:
        HW *= d
    assert tuple(target.shape) == (B,) + spatial

    # Keep the incoming dtype (bf16 stays bf16 -> half the HBM read traffic);
    # the kernel upcasts to f32 internally.
    x = logits.reshape(B, C, HW)
    t = target.reshape(B, 1, HW).astype(jnp.int32)

    # Large lane tiles: this kernel is HBM/overhead bound; 2048 lanes keeps
    # VMEM use tiny (C * 2048 * 4B double-buffered) even on v7x's smaller VMEM.
    TILE = min(2048, pl.cdiv(HW, 128) * 128)
    n_s = pl.cdiv(HW, TILE)

    kernel = functools.partial(
        _focal_kernel, alpha=float(alpha), gamma=float(gamma), hw=HW, tile=TILE)

    cost = pl.CostEstimate(
        flops=12 * B * C * HW,
        transcendentals=B * HW * (C + 3),
        bytes_accessed=int(x.size) * x.dtype.itemsize
        + int(t.size) * 4
        + B * 8 * 128 * 4,
    )

    partial_out = pl.pallas_call(
        kernel,
        out_shape=jax.ShapeDtypeStruct((B, 8, 128), jnp.float32),
        grid_spec=pltpu.PrefetchScalarGridSpec(
            num_scalar_prefetch=0,
            grid=(B, n_s),
            in_specs=[
                pl.BlockSpec((1, C, TILE), lambda b, s: (b, 0, s)),
                pl.BlockSpec((1, 1, TILE), lambda b, s: (b, 0, s)),
            ],
            out_specs=pl.BlockSpec((1, 8, 128), lambda b, s: (b, 0, 0)),
            scratch_shapes=[pltpu.VMEM((1, TILE), jnp.float32)],
        ),
        compiler_params=pltpu.CompilerParams(
            # batch axis parallel (each batch owns its output block -> no race,
            # lets v7x shard batches across its two TensorCores); spatial
            # reduction axis stays sequential.
            dimension_semantics=("parallel", "arbitrary")),
        cost_estimate=cost,
    )(x, t)

    total = jnp.sum(partial_out[:, 0, 0])
    if reduction == "mean":
        return total / jnp.float32(B * HW)
    return total


class FocalLoss:
    """Mirror of the PyTorch FocalLoss module (forward only)."""

    def __init__(self, config):
        self.alpha = config["alpha"]
        self.gamma = config["gamma"]
        self.reduction = config["reduction"]

    def __call__(self, logits, target):
        return focal_loss_pallas(logits, target, self.alpha, self.gamma,
                                 self.reduction)


def _focal_loss_ref(logits, target, alpha, gamma):
    """Plain-JAX reference for a sanity check (mean reduction)."""
    p = jax.nn.softmax(logits, axis=1)
    logp = jax.nn.log_softmax(logits, axis=1)
    C = logits.shape[1]
    one_hot = jax.nn.one_hot(target, C, dtype=logits.dtype)       # (B, *S, C)
    one_hot = jnp.moveaxis(one_hot, -1, 1)                         # (B, C, *S)
    focal = -alpha * jnp.power(1.0 - p, gamma) * logp
    loss_tmp = jnp.sum(one_hot * focal, axis=1)
    return jnp.mean(loss_tmp)


if __name__ == "__main__":
    key = jax.random.PRNGKey(0)
    k1, k2, k3, k4 = jax.random.split(key, 4)

    # primary small test: B=2, C=4, 16x16 spatial (matches the module's BxCxHxW)
    B, C, H, W = 2, 4, 16, 16
    logits = jax.random.normal(k1, (B, C, H, W), dtype=jnp.float32)
    target = jax.random.randint(k2, (B, H, W), 0, C, dtype=jnp.int32)

    loss_fn = FocalLoss({"alpha": 4.0, "gamma": 2.0, "reduction": "mean"})
    loss = jax.block_until_ready(loss_fn(logits, target))
    ref = _focal_loss_ref(logits, target, 4.0, 2.0)
    assert jnp.allclose(loss, ref, rtol=1e-4, atol=1e-5), (loss, ref)

    # ragged spatial size (H*W not a multiple of 128) exercises the in-kernel
    # tail masking (no wrapper-side jnp.pad / extra HBM copy anymore).
    B2, C2, H2, W2 = 2, 5, 10, 13
    logits2 = jax.random.normal(k3, (B2, C2, H2, W2), dtype=jnp.float32)
    target2 = jax.random.randint(k4, (B2, H2, W2), 0, C2, dtype=jnp.int32)
    loss2 = jax.block_until_ready(
        focal_loss_pallas(logits2, target2, alpha=4.0, gamma=2.0,
                          reduction="mean"))
    ref2 = _focal_loss_ref(logits2, target2, 4.0, 2.0)
    assert jnp.allclose(loss2, ref2, rtol=1e-4, atol=1e-5), (loss2, ref2)

    print("KERNEL_OK")
</pallas_src>

<mosaic_0001>
module attributes {stable_mosaic.version = 11 : i64} {
  func.func @_focal_kernel(%arg0: i32, %arg1: i32, %arg2: memref<1x4x256xf32, #tpu.memory_space<vmem>>, %arg3: memref<1x1x256xi32, #tpu.memory_space<vmem>>, %arg4: memref<1x8x128xf32, #tpu.memory_space<vmem>>, %arg5: memref<1x256xf32, #tpu.memory_space<vmem>>) attributes {dimension_semantics = [#tpu.dimension_semantics<parallel>, #tpu.dimension_semantics<arbitrary>], iteration_bounds = array<i64: 2, 1>, scalar_prefetch = 0 : i64, scratch_operands = 1 : i64, tpu.core_type = #tpu.core_type<tc>, window_params = [{transform_indices = @transform_0, window_bounds = array<i64: 1, 4, 256>}, {transform_indices = @transform_1, window_bounds = array<i64: 1, 1, 256>}, {transform_indices = @transform_2, window_bounds = array<i64: 1, 8, 128>}]} {
    %c0_i32 = arith.constant 0 : i32
    %0 = arith.cmpi eq, %arg1, %c0_i32 : i32
    %1 = arith.extui %0 : i1 to i32
    %c0_i32_0 = arith.constant 0 : i32
    %2 = arith.cmpi ne, %1, %c0_i32_0 : i32
    scf.if %2 {
      %cst_19 = arith.constant 0.000000e+00 : f32
      %45 = vector.broadcast %cst_19 : f32 to vector<1x256xf32>
      %c0_20 = arith.constant 0 : index
      %c0_21 = arith.constant 0 : index
      %46 = vector.load %arg5[%c0_20, %c0_21] : memref<1x256xf32, #tpu.memory_space<vmem>>, vector<1x256xf32>
      tpu.vector_store %arg5[%c0_20, %c0_21], %45 {strides = array<i32>} : memref<1x256xf32, #tpu.memory_space<vmem>>, vector<1x256xf32>,
    } else {
    }
    %c0 = arith.constant 0 : index
    %c0_1 = arith.constant 0 : index
    %c0_2 = arith.constant 0 : index
    %3 = vector.load %arg2[%c0, %c0_1, %c0_2] : memref<1x4x256xf32, #tpu.memory_space<vmem>>, vector<1x4x256xf32>
    %4 = vector.shape_cast %3 : vector<1x4x256xf32> to vector<4x256xf32>
    %c0_3 = arith.constant 0 : index
    %c0_4 = arith.constant 0 : index
    %c0_5 = arith.constant 0 : index
    %5 = vector.load %arg3[%c0_3, %c0_4, %c0_5] : memref<1x1x256xi32, #tpu.memory_space<vmem>>, vector<1x1x256xi32>
    %6 = vector.shape_cast %5 : vector<1x1x256xi32> to vector<1x256xi32>
    %cst = arith.constant dense<0xFF800000> : vector<256xf32>
    %7 = vector.multi_reduction <maximumf>, %4, %cst [0] : vector<4x256xf32> to vector<256xf32>
    %8 = vector.shape_cast %7 : vector<256xf32> to vector<1x256xf32>
    %9 = vector.broadcast %8 : vector<1x256xf32> to vector<4x256xf32>
    %10 = arith.subf %4, %9 : vector<4x256xf32>
    %11 = math.exp %10 : vector<4x256xf32>
    %cst_6 = arith.constant dense<0.000000e+00> : vector<256xf32>
    %12 = vector.multi_reduction <add>, %11, %cst_6 [0] : vector<4x256xf32> to vector<256xf32>
    %13 = vector.shape_cast %12 : vector<256xf32> to vector<1x256xf32>
    %14 = tpu.iota {dimensions = array<i32: 0>} : vector<4x256xi32>
    %15 = vector.broadcast %6 : vector<1x256xi32> to vector<4x256xi32>
    %16 = arith.cmpi eq, %14, %15 : vector<4x256xi32>
    %cst_7 = arith.constant 0.000000e+00 : f32
    %17 = vector.broadcast %cst_7 : f32 to vector<4x256xf32>
    %18 = arith.select %16, %4, %17 : vector<4x256xi1>, vector<4x256xf32>
    %cst_8 = arith.constant dense<0.000000e+00> : vector<256xf32>
    %19 = vector.multi_reduction <add>, %18, %cst_8 [0] : vector<4x256xf32> to vector<256xf32>
    %20 = vector.shape_cast %19 : vector<256xf32> to vector<1x256xf32>
    %21 = arith.subf %20, %8 : vector<1x256xf32>
    %22 = math.log %13 : vector<1x256xf32>
    %23 = arith.subf %21, %22 : vector<1x256xf32>
    %24 = math.exp %23 : vector<1x256xf32>
    %cst_9 = arith.constant 1.000000e+00 : f32
    %25 = vector.broadcast %cst_9 : f32 to vector<1x256xf32>
    %26 = arith.subf %25, %24 : vector<1x256xf32>
    %27 = arith.mulf %26, %26 : vector<1x256xf32>
    %cst_10 = arith.constant 0.000000e+00 : f32
    %28 = vector.broadcast %cst_10 : f32 to vector<1x256xf32>
    %29 = arith.subf %28, %23 : vector<1x256xf32>
    %30 = arith.mulf %27, %29 : vector<1x256xf32>
    %c256_i32 = arith.constant 256 : i32
    %31 = arith.muli %arg1, %c256_i32 : i32
    %32 = tpu.iota {dimensions = array<i32: 1>} : vector<1x256xi32>
    %33 = vector.broadcast %31 : i32 to vector<1x256xi32>
    %34 = arith.addi %33, %32 : vector<1x256xi32>
    %c256_i32_11 = arith.constant 256 : i32
    %35 = vector.broadcast %c256_i32_11 : i32 to vector<1x256xi32>
    %36 = arith.cmpi slt, %34, %35 : vector<1x256xi32>
    %cst_12 = arith.constant 0.000000e+00 : f32
    %37 = vector.broadcast %cst_12 : f32 to vector<1x256xf32>
    %38 = arith.select %36, %30, %37 : vector<1x256xi1>, vector<1x256xf32>
    %c0_13 = arith.constant 0 : index
    %c0_14 = arith.constant 0 : index
    %39 = vector.load %arg5[%c0_13, %c0_14] : memref<1x256xf32, #tpu.memory_space<vmem>>, vector<1x256xf32>
    %40 = arith.addf %39, %38 : vector<1x256xf32>
    %c0_15 = arith.constant 0 : index
    %c0_16 = arith.constant 0 : index
    %41 = vector.load %arg5[%c0_15, %c0_16] : memref<1x256xf32, #tpu.memory_space<vmem>>, vector<1x256xf32>
    tpu.vector_store %arg5[%c0_15, %c0_16], %40 {strides = array<i32>} : memref<1x256xf32, #tpu.memory_space<vmem>>, vector<1x256xf32>,
    %c0_i32_17 = arith.constant 0 : i32
    %42 = arith.cmpi eq, %arg1, %c0_i32_17 : i32
    %43 = arith.extui %42 : i1 to i32
    %c0_i32_18 = arith.constant 0 : i32
    %44 = arith.cmpi ne, %43, %c0_i32_18 : i32
    scf.if %44 {
      %c0_19 = arith.constant 0 : index
      %c0_20 = arith.constant 0 : index
      %45 = vector.load %arg5[%c0_19, %c0_20] : memref<1x256xf32, #tpu.memory_space<vmem>>, vector<1x256xf32>
      %46 = vector.shape_cast %45 : vector<1x256xf32> to vector<1x1x256xf32>
      %cst_21 = arith.constant dense<0.000000e+00> : vector<1xf32>
      %47 = vector.multi_reduction <add>, %46, %cst_21 [1, 2] : vector<1x1x256xf32> to vector<1xf32>
      %48 = vector.shape_cast %47 : vector<1xf32> to vector<1x1x1xf32>
      %49 = vector.extract %48[0, 0, 0] : f32 from vector<1x1x1xf32>
      %cst_22 = arith.constant 4.000000e+00 : f32
      %50 = arith.mulf %49, %cst_22 : f32
      %cst_23 = arith.constant 1.000000e+00 : f32
      %51 = vector.broadcast %cst_23 : f32 to vector<1x8x128xf32>
      %52 = vector.broadcast %50 : f32 to vector<1x8x128xf32>
      %53 = arith.mulf %52, %51 : vector<1x8x128xf32>
      %c0_24 = arith.constant 0 : index
      %c0_25 = arith.constant 0 : index
      %c0_26 = arith.constant 0 : index
      %54 = vector.load %arg4[%c0_24, %c0_25, %c0_26] : memref<1x8x128xf32, #tpu.memory_space<vmem>>, vector<1x8x128xf32>
      tpu.vector_store %arg4[%c0_24, %c0_25, %c0_26], %53 {strides = array<i32>} : memref<1x8x128xf32, #tpu.memory_space<vmem>>, vector<1x8x128xf32>,
    } else {
    }
    return
  }
  func.func @transform_0(%arg0: i32, %arg1: i32) -> (i32, i32, i32) {
    %c0_i32 = arith.constant 0 : i32
    %c0_i32_0 = arith.constant 0 : i32
    return %arg0, %c0_i32, %arg1 : i32, i32, i32
  }
  func.func @transform_1(%arg0: i32, %arg1: i32) -> (i32, i32, i32) {
    %c0_i32 = arith.constant 0 : i32
    %c0_i32_0 = arith.constant 0 : i32
    return %arg0, %c0_i32, %arg1 : i32, i32, i32
  }
  func.func @transform_2(%arg0: i32, %arg1: i32) -> (i32, i32, i32) {
    %c0_i32 = arith.constant 0 : i32
    %c0_i32_0 = arith.constant 0 : i32
    %c0_i32_1 = arith.constant 0 : i32
    return %arg0, %c0_i32, %c0_i32_0 : i32, i32, i32
  }
}

</mosaic_0001>

<bundles_post_ra>
// kernel: tpu_custom_call.1
= control target key start
LH: loop header
LB: loop body
LE: loop exit
PB: predicated region body
PF: predicated region fallthrough
CT: control target
= control target key end

     0   :  { %7 = vsyncpa [#allocation4], 0  ;;  %s922_s0 = inlined_call_operand.hbm [shape: f32[2,4,256], index: 0, kind: input, shape index: {}]   ;;  %s923_s1 = inlined_call_operand.hbm [shape: s32[2,1,256], index: 1, kind: input, shape index: {}]   ;;  %s924_s2 = inlined_call_operand.hbm [shape: f32[2,8,128], index: 2, kind: output, shape index: {}]  }
   0x1   :  { %9 = vsyncpa [#allocation4 + $0x1], 0 }
   0x2   :  { %10 = vsyncpa [#allocation7], 0 }
   0x3   :  { %12 = vsyncpa [#allocation7 + $0x1], 0 }
   0x4   :  { %13 = vsyncpa [#allocation5], 0 }
   0x5   :  { %15 = vsyncpa [#allocation5 + $0x1], 0  ;;  %s762_s9 = smov 0   ;;  %s764_s10 = smov 0  }
   0x6   :  { %s766_s11 = smov 0   ;;  %s768_s12 = smov 0  }
   0x7   :  { %s770_s13 = smov 0   ;;  %s772_s14 = smov 0  }
   0x8 LB: > { %s500_s15 = sadd.s32 4294967295, %s744_s14   ;;  %s501_s16 = sadd.s32 4294967294, %s744_s14   ;;  %s744_s14 = sphi %s772_s14, %s21_s14   ;;  %s740_s13 = sphi %s770_s13, %s936_s13   ;;  %s736_s12 = sphi %s768_s12, %s935_s12   ;;  %s732_s11 = sphi %s766_s11, %s934_s11   ;;  %s728_s10 = sphi %s764_s10, %s933_s10   ;;  %s724_s9 = sphi %s762_s9, %s932_s9  }
   0x9   : > { %s33_s17 = sadd.s32 1, %s740_s13  ;;  %s42_s18 = sadd.s32 1, %s732_s11 }
   0xa   : > { %p35_p0 = scmp.ge.s32.totalorder %s33_s17, 2  ;;  %p49_p1 = scmp.ne.s32.totalorder %s732_s11, %s728_s10 }
   0xb   : > { %p50_p2 = scmp.eq.s32.totalorder %s744_s14, 0  ;;  %p55_p3 = scmp.ne.s32.totalorder %s728_s10, %s724_s9 }
   0xc   : > { %s938_s17 = smov (%p35_p0, %s33_s17), 0  ;;  %p56_p5 = scmp.eq.s32.totalorder %s500_s15, 0 }
   0xd   : > { %p803_p4 = por %p50_p2, %p49_p1  ;;  %s37_s20 = ssub.s32 %s740_s13, %s938_s17 }
   0xe   : > { %p107_p6 = scmp.eq.s32.totalorder %s500_s15, 1  ;;  %p40_p7 = scmp.eq.s32.totalorder %s37_s20, 0 }
   0xf   : > { %p809_p8 = por %p56_p5, %p55_p3  ;;  %p113_p10 = scmp.eq.s32.totalorder %s501_s16, 1 }
  0x10   : > { %p813_p9 = por %p107_p6, %p49_p1  ;;  %p503_p12 = scmp.ge.s32.totalorder %s744_s14, 2 }
  0x11   : > { %s818_s23 = scalar_select %p40_p7, %s732_s11, %s42_s18  }
  0x12   : > { %p820_p11 = por %p113_p10, %p55_p3  ;;  %p537_p13 = scmp.lt.s32.totalorder %s744_s14, 2 }
  0x13   : > { %s133_s25 = sand.u32 1, %s732_s11   ;;  %s517_s27 = sshll.u32 %s740_s13, 3 }
  0x14   : > { %s504_s26 = sshll.u32 %s133_s25, 3  ;;  %s144_s30 = scalar_lea.hbm %s922_s0, %s517_s27 }
  0x15   : > { %s137_s3 = scalar_lea.vmem [#allocation3], %s504_s26  ;;  %s146_s5 = sshll.u32 %s144_s30, 4  ;;  %s147_s5 = int_to_ptr.hbm [resolvable:$true] %s146_s5 }
  0x16   : > { %s148_s4 = sshll.u32 %s137_s3, 4  ;;  %p833_p0 = pnand %p537_p13, %p803_p4  ;;  %s149_s4 = int_to_ptr.vmem [resolvable:$true] %s148_s4 }
  0x17   : > { %p509_p1 = scmp.ge.s32.totalorder %s744_s14, 1  ;;  %p174_p2 = scmp.lt.s32.totalorder %s744_s14, 3 }
  0x18   : > { %s134_s7 = scalar_lea.sflag [#allocation4], %s133_s25  ;;  %s507_s8 = sshll.u32 %s133_s25, 1 }
  0x19   : > { %529 = dma.hbm_to_vmem [thread:$0]  (!%p833_p0), %s147_s5, 128, %s149_s4, %s134_s7  }
  0x1a   : > { %p175_p3 = pnand %p509_p1, %p174_p2  ;;  %s508_s15 = sshll.u32 %s740_s13, 1 }
  0x1b   : > { %s165_s20 = scalar_lea.hbm %s923_s1, %s508_s15  ;;  %s159_s26 = scalar_lea.vmem [#allocation6], %s507_s8 }
  0x1c   : > { %s169_s19 = sshll.u32 %s159_s26, 4  ;;  %s167_s27 = sshll.u32 %s165_s20, 4  ;;  %s170_s19 = int_to_ptr.vmem [resolvable:$true] %s169_s19  ;;  %s168_s27 = int_to_ptr.hbm [resolvable:$true] %s167_s27 }
  0x1d   : > { %s156_s28 = scalar_lea.sflag [#allocation7], %s133_s25  ;;  %178 = sbr.rel (%p175_p3) target bundleno = 326 (0x146), region = 28 }
  0x1e   : > { %532 = dma.hbm_to_vmem [thread:$0]  (!%p833_p0), %s168_s27, 32, %s170_s19, %s156_s28  }
  0x1f   : > { %s848_s29 = sand.u32 (!%p175_p3), 1, %s728_s10  }
  0x20   : > { %s510_s30 = sshll.u32 (!%p175_p3), %s848_s29, 3  ;;  %s181_s3 = scalar_lea.sflag (!%p175_p3), [#allocation4], %s848_s29 }
  0x21   : > { %s184_s4 = scalar_lea.vmem (!%p175_p3), [#allocation3], %s510_s30 }
  0x22   : > { %711 = dma.done.wait (%p809_p8), %s181_s3, 128  }
  0x23   : > { %713 = vsyncadd (%p809_p8), %s181_s3, 4294967168  ;;  %s511_s25 = sshll.u32 %s848_s29, 1  ;;  %s191_s5 = scalar_lea.sflag [#allocation7], %s848_s29 }
  0x24   : > { %s860_s6 = scalar_lea.vmem [#allocation6], %s511_s25 }
  0x25   : > { %715 = dma.done.wait (%p809_p8), %s191_s5, 32  }
  0x26   : > { %717 = vsyncadd (%p809_p8), %s191_s5, 4294967264  ;;  %v227_v0 = vlaneseq  ;;  %v746_v2 = vmov 0.0   ;;  %v232_v3 = vld [vmem:[%s184_s4] sm:$0xff]  ;;  %vm240_vm1 = vcmask 1043456   ;;  %v233_v25 = vld [vmem:[%s860_s6] sm:$0x3] }
  0x27   : > { %235 = vst [vmem:[#allocation1] ss:$2 sm:$0xff] %v232_v3  ;;  %v285_v33 = vperm.slane %v233_v25, 0  ;;  %v286_v34 = vperm.slane %v233_v25, 1  ;;  %vm345_vm4 = vcmask 1040384   ;;  %s514_s21 = sshll.u32 %s736_s12, 3 }
  0x28   : > { %vm866_vm0 = vcmp.lt.s32.totalorder %v227_v0, 256  ;;  %v284_v30 = vshrl.u32 %v227_v0, 7  ;;  %s389_s15 = scalar_lea.hbm %s924_s2, %s514_s21  ;;  %s220_s16 = scalar_lea.vmem [#allocation8], %s510_s30 }
  0x29   : > { %231 = vst.msk [vmem:[#allocation2] sm:$0x3] %vm866_vm0, %v746_v2  ;;  %s391_s18 = sshll.u32 %s220_s16, 4  ;;  %s393_s20 = sshll.u32 %s389_s15, 4  ;;  %s392_s18 = int_to_ptr.vmem [resolvable:$true] %s391_s18  ;;  %s394_s20 = int_to_ptr.hbm [resolvable:$true] %s393_s20 }
  0x2a   : > { %vm287_vm2 = vcmp.eq.s32.totalorder %v284_v30, %v285_v33  ;;  %vm288_vm3 = vcmp.eq.s32.totalorder %v284_v30, %v286_v34  ;;  %s379_s27 = scalar_lea.sflag [#allocation5], %s848_s29  ;;  %s672_s28 = sshra.s32 %s394_s20, 4  ;;  %s673_s28 = int_to_ptr.hbm [resolvable:$true] %s672_s28 }
  0x2b   : > { %s674_s3 = scalar_lea.hbm %s673_s28, 8  ;;  %s678_s30 = scalar_lea.hbm %s924_s2, 16 }
  0x2c   : > { %p675_p4 = scmp.ne.s32.totalorder %s673_s28, %s674_s3  ;;  %p679_p7 = scmp.lt.s32.totalorder %s673_s28, %s924_s2 }
  0x2d   : > { %p680_p8 = scmp.lt.s32.totalorder %s678_s30, %s674_s3 }
  0x2e   : > { %v236_v4 = vld.sshfl [vmem:[#allocation1] sm:$0xff pattern:$0x75316420]  ;;  %v237_v5 = vld.sshfl [vmem:[#allocation1 + $0x8] sm:$0xff pattern:$0x75316420]  ;;  %p676_p5 = pnand %p675_p4, %p813_p9 }
  0x2f   : > { %v241_v6 = vsel %vm240_vm1, %v236_v4, -inf  ;;  %v248_v7 = vsel %vm240_vm1, %v237_v5, -inf  ;;  %p681_p10 = por %p680_p8, %p679_p7 }
  0x30   : > { %v242_v8 = vrot.slane %v241_v6, 4  ;;  %v249_v9 = vrot.slane %v248_v7, 4  ;;  %p677_p6 = pneg %p676_p5 }
  0x32   : > { %v243_v10 = vmax.f32 %v241_v6, %v242_v8  ;;  %v250_v11 = vmax.f32 %v248_v7, %v249_v9  ;;  %p682_p13 = pnand %p681_p10, %p677_p6 }
  0x34   : > { %v244_v12 = vrot.slane %v243_v10, 2  ;;  %v251_v13 = vrot.slane %v250_v11, 2 }
  0x36   : > { %v245_v14 = vmax.f32 %v243_v10, %v244_v12  ;;  %v252_v15 = vmax.f32 %v250_v11, %v251_v13 }
  0x38   : > { %v246_v16 = vrot.slane %v245_v14, 1  ;;  %v253_v17 = vrot.slane %v252_v15, 1 }
  0x3a   : > { %v247_v18 = vmax.f32 %v245_v14, %v246_v16  ;;  %v254_v19 = vmax.f32 %v252_v15, %v253_v17 }
  0x3c   : > { %v257_v20 = vrot.slane %v254_v19, 4 }
  0x3e   : > { %v258_v21 = vsel %vm240_vm1, %v247_v18, %v257_v20 }
  0x3f   : > { %v260_v22 = vsub.f32 %v232_v3, %v258_v21 }
  0x41   : > { %v261_v23 = vmul.f32 1.442695, %v260_v22  ;;  %v341_v22 = vld [vmem:[#allocation2] sm:$0x3] }
  0x43   : > { %588 = vpow2.f32 %v261_v23 }
  0x49   : > { %v589_v24 = vpop.eup %588 }
  0x4a   : > { %264 = vst [vmem:[#allocation1] ss:$2 sm:$0xff] %v589_v24 }
  0x51   : > { %v265_v26 = vld.sshfl [vmem:[#allocation1] sm:$0xff pattern:$0x75316420]  ;;  %v266_v27 = vld.sshfl [vmem:[#allocation1 + $0x8] sm:$0xff pattern:$0x75316420] }
  0x52   : > { %v269_v28 = vsel %vm240_vm1, %v265_v26, 0.0  ;;  %v276_v29 = vsel %vm240_vm1, %v266_v27, 0.0  ;;  %289 = vst [vmem:[#allocation1] ss:$2 sm:$0xff] %v232_v3 }
  0x53   : > { %v270_v31 = vrot.slane %v269_v28, 4  ;;  %v277_v32 = vrot.slane %v276_v29, 4 }
  0x55   : > { %v271_v35 = vadd.f32 %v270_v31, %v269_v28  ;;  %v278_v36 = vadd.f32 %v277_v32, %v276_v29 }
  0x57   : > { %v272_v37 = vrot.slane %v271_v35, 2  ;;  %v279_v38 = vrot.slane %v278_v36, 2 }
  0x59   : > { %v273_v39 = vadd.f32 %v272_v37, %v271_v35  ;;  %v280_v40 = vadd.f32 %v279_v38, %v278_v36  ;;  %v290_v41 = vld.sshfl [vmem:[#allocation1] sm:$0xff pattern:$0x75316420]  ;;  %v291_v42 = vld.sshfl [vmem:[#allocation1 + $0x8] sm:$0xff pattern:$0x75316420] }
  0x5a   : > { %v294_v43 = vsel %vm287_vm2, %v290_v41, 0.0  ;;  %v295_v44 = vsel %vm288_vm3, %v291_v42, 0.0 }
  0x5b   : > { %v274_v45 = vrot.slane %v273_v39, 1  ;;  %v281_v46 = vrot.slane %v280_v40, 1  ;;  %v296_v47 = vsel %vm240_vm1, %v294_v43, 0.0  ;;  %v303_v48 = vsel %vm240_vm1, %v295_v44, 0.0 }
  0x5c   : > { %v297_v49 = vrot.slane %v296_v47, 4  ;;  %v304_v50 = vrot.slane %v303_v48, 4 }
  0x5d   : > { %v275_v51 = vadd.f32 %v274_v45, %v273_v39  ;;  %v282_v52 = vadd.f32 %v281_v46, %v280_v40 }
  0x5e   : > { %v298_v53 = vadd.f32 %v297_v49, %v296_v47  ;;  %v305_v54 = vadd.f32 %v304_v50, %v303_v48 }
  0x5f   : > { %590 = vlog2.f32 %v275_v51 }
  0x60   : > { %v299_v55 = vrot.slane %v298_v53, 2  ;;  %v306_v56 = vrot.slane %v305_v54, 2  ;;  %592 = vlog2.f32 %v282_v52 }
  0x62   : > { %v300_v57 = vadd.f32 %v299_v55, %v298_v53  ;;  %v307_v58 = vadd.f32 %v306_v56, %v305_v54 }
  0x64   : > { %v301_v59 = vrot.slane %v300_v57, 1  ;;  %v308_v60 = vrot.slane %v307_v58, 1 }
  0x65   : > { %v591_v61 = vpop.eup %590 }
  0x66   : > { %v593_v62 = vpop.eup %592  ;;  %v302_v63 = vadd.f32 %v301_v59, %v300_v57  ;;  %v309_v0 = vadd.f32 %v308_v60, %v307_v58  ;;  %v313_v2 = vmul.f32 0.6931472, %v591_v61 }
  0x67   : > { %v315_v3 = vmul.f32 0.6931472, %v593_v62 }
  0x68   : > { %v310_v4 = vsub.f32 %v302_v63, %v247_v18  ;;  %v311_v5 = vsub.f32 %v309_v0, %v254_v19 }
  0x6a   : > { %v316_v6 = vsub.f32 %v310_v4, %v313_v2  ;;  %v317_v7 = vsub.f32 %v311_v5, %v315_v3 }
  0x6c   : > { %v318_v8 = vmul.f32 1.442695, %v316_v6  ;;  %v320_v9 = vmul.f32 1.442695, %v317_v7  ;;  %v326_v14 = vsub.f32 0.0, %v316_v6  ;;  %v327_v15 = vsub.f32 0.0, %v317_v7 }
  0x6e   : > { %594 = vpow2.f32 %v318_v8 }
  0x6f   : > { %596 = vpow2.f32 %v320_v9 }
  0x74   : > { %v595_v10 = vpop.eup %594 }
  0x75   : > { %v597_v11 = vpop.eup %596  ;;  %v322_v12 = vsub.f32 1.0, %v595_v10 }
  0x76   : > { %v323_v13 = vsub.f32 1.0, %v597_v11 }
  0x77   : > { %v324_v16 = vmul.f32 %v322_v12, %v322_v12 }
  0x78   : > { %v325_v17 = vmul.f32 %v323_v13, %v323_v13 }
  0x79   : > { %v328_v20 = vmul.f32 %v326_v14, %v324_v16 }
  0x7a   : > { %v329_v21 = vmul.f32 %v327_v15, %v325_v17 }
  0x7c   : > { %v344_v18 = vrot.slane %v329_v21, 7 }
  0x7e   : > { %v346_v19 = vsel %vm345_vm4, %v328_v20, %v344_v18 }
  0x7f   : > { %v348_v23 = vadd.f32 %v346_v19, %v341_v22 }
  0x81   : > { %353 = vst.msk [vmem:[#allocation2] sm:$0x3] %vm866_vm0, %v348_v23 }
  0x88   : > { %v357_v24 = vld [vmem:[#allocation2] sm:$0x3] }
  0x89   : > { %v359_v25 = vperm.slane %v357_v24, 0  ;;  %v360_v26 = vperm.slane %v357_v24, 1 }
  0x8b   : > { %v363_v27 = vsel %vm345_vm4, %v359_v25, 0.0  ;;  %v364_v28 = vsel %vm345_vm4, %v360_v26, 0.0 }
  0x8c   : > { %v365_v29 = vadd.f32 %v364_v28, %v363_v27 }
  0x8e   : > { %366 = vadd.xlane.f32.xlu0 %v365_v29 }
 0x101   : > { %v367_v30 = vpop.xlane.xlu0 %366 }
 0x102   : > { %v368_v31 = vrot.slane %v367_v30, 4 }
 0x104   : > { %v369_v32 = vadd.f32 %v368_v31, %v367_v30 }
 0x106   : > { %v370_v33 = vrot.slane %v369_v32, 2 }
 0x108   : > { %v371_v34 = vadd.f32 %v370_v33, %v369_v32 }
 0x10a   : > { %v372_v35 = vrot.slane %v371_v34, 1 }
 0x10c   : > { %v373_v36 = vadd.f32 %v372_v35, %v371_v34 }
 0x10e   : > { %518 = vpush %v373_v36 }
 0x13f   : > { %s519_s26 = spop %518 }
 0x140   : > { %s375_s19 = smul.f32 4.0, %s519_s26 }
 0x142   : > { %v376_v1 = vstv %s375_s19 }
 0x143   : > { %377 = vst [vmem:[%s220_s16] sm:$0xff] %v376_v1 }
 0x144   : > { %685 = shalt.err (!%p682_p13)
}
 0x145   : > { %524 = dma.vmem_to_hbm [thread:$0]  (%p813_p9), %s392_s18, 128, %s394_s20, %s379_s27  }
 0x146 PF: > { %s405_s29 = sand.u32 1, %s724_s9   ;;  %p534_p0 = pnand %p503_p12, %p820_p11 }
 0x147   : > { %s406_s6 = scalar_lea.sflag [#allocation5], %s405_s29 }
 0x148   : > { %p535_p1 = pneg %p534_p0 }
 0x14a   : > { %719 = dma.done.wait (%p535_p1), %s406_s6, 128  }
 0x14b   : > { %721 = vsyncadd (%p535_p1), %s406_s6, 4294967168  ;;  %s21_s14 = sadd.s32 1, %s744_s14   ;;  %s932_s9 = smov %s728_s10 }
 0x14c   : > { %p18_p2 = scmp.ge.s32.totalorder %s21_s14, 4   ;;  %s933_s10 = smov %s732_s11 }
 0x14d   : > { %s934_s11 = smov %s818_s23  ;;  %s935_s12 = smov %s740_s13 }
 0x14e   : > { %s936_s13 = smov %s938_s17  ;;  %20 = sbr.rel (!%p18_p2) target bundleno = 8 (0x8), region = 94 }
 0x153   :  { %412 = vsyncpa [#allocation4], 1 }
 0x154   :  { %414 = vsyncpa [#allocation4 + $0x1], 1 }
 0x155   :  { %415 = vsyncpa [#allocation7], 1 }
 0x156   :  { %417 = vsyncpa [#allocation7 + $0x1], 1 }
 0x157   :  { %418 = vsyncpa [#allocation5], 1 }
 0x158   :  { %420 = vsyncpa [#allocation5 + $0x1], 1 }

</bundles_post_ra>
